<compile_context>
chip_gen: v7x
topology: tpu7x:2x2x1
jax: 0.10.0
libtpu: 0.0.40
codegen_flags: <defaults>
</compile_context>

<pallas_src>
import jax
import jax.numpy as jnp
from jax.experimental import pallas as pl
from jax.experimental.pallas import tpu as pltpu

_MiB = 1024 * 1024
# Approx. number of full-tile f32 values live inside the kernel body
# (the upcast x plus the fused output expression) -- charged in the budget.
_F32_INTERMEDIATE_TILES = 2


def _layernorm_kernel(x_ref, gamma_ref, beta_ref, o_ref, *, eps, features):
    """LayerNorm over the last axis of one (row_tile, features) block."""
    x = x_ref[...].astype(jnp.float32)                  # single live f32 tile
    # One-pass moments (sum and sum-of-squares) -> mean / unbiased variance.
    # Avoids holding full-tile `diff` and `diff*diff` temporaries across the
    # reduction, which previously spilled extra f32 tiles to VMEM scratch.
    s = jnp.sum(x, axis=-1, keepdims=True)              # (rows_tile, 1)
    ss = jnp.sum(x * x, axis=-1, keepdims=True)         # (rows_tile, 1)
    mean = s * jnp.float32(1.0 / features)
    # Unbiased variance (ddof=1), like torch.Tensor.std's default.
    # TODO(synk): features == 1 gives 0/0 = nan, same as torch.std(unbiased=True).
    var = (ss - mean * s) / jnp.float32(features - 1)
    var = jnp.maximum(var, jnp.float32(0.0))            # guard tiny cancellation
    denom = jnp.sqrt(var) + jnp.float32(eps)            # eps added to std, per module
    # EUP approximate reciprocal (separate bundle slot) + one Newton refinement
    # step on the VPU -> essentially full f32 precision, no VALU divide.
    inv = pl.reciprocal(denom, approx=True)
    inv = inv * (jnp.float32(2.0) - denom * inv)
    gamma = gamma_ref[...].astype(jnp.float32)           # (1, F)
    beta = beta_ref[...].astype(jnp.float32)             # (1, F)
    o_ref[...] = ((x - mean) * inv * gamma + beta).astype(o_ref.dtype)


def _round_up(x, m):
    return ((x + m - 1) // m) * m


def _cdiv(a, b):
    return -(-a // b)


def _sublane_pack(itemsize):
    # Sublane packing: 8 rows for 4-byte dtypes, 16 for 2-byte, 32 for 1-byte.
    return max(8, 8 * (4 // max(int(itemsize), 1)))


def _tpu_hw_params():
    """Generation-aware (tile_budget_bytes, vmem_limit_bytes, min_grid_steps, two_cores)."""
    kind = ""
    vmem_cap = None
    try:
        kind = jax.devices()[0].device_kind.lower()
    except Exception:
        kind = ""
    try:
        vmem_cap = int(pltpu.get_tpu_info().vmem_capacity_bytes)
    except Exception:
        vmem_cap = None

    is_v7 = ("v7" in kind) or ("7x" in kind)
    if not kind and vmem_cap is not None and vmem_cap <= 64 * _MiB + _MiB:
        is_v7 = True  # 64 MiB VMEM per TC is the v7x signature

    if is_v7:
        # v7x: 64 MiB VMEM/TC, 2 TCs, 3.2 TB/s HBM -> big-ish tiles to amortize
        # the ~0.35 us/step overhead, but stay well under physical VMEM, and
        # target >= 4 grid steps per core for DMA/compute overlap + balance.
        return 10 * _MiB, 56 * _MiB, 8, True
    if ("v5e" in kind) or ("v5 lite" in kind) or ("v5lite" in kind):
        # v5e: ~820 GB/s HBM, 4 MiB tiles already make step overhead <4%; the
        # explicit limit (> 16 MiB scoped default, < 128 MiB physical) is the
        # only knob that matters here.
        return 4 * _MiB, 48 * _MiB, 2, False
    # v6e (and other 128 MiB-VMEM parts such as v5p/v4): fewer, larger steps.
    return 12 * _MiB, 96 * _MiB, 2, False


def _pick_row_tile(rows, features, in_itemsize, out_itemsize,
                   tile_budget_bytes, vmem_limit_bytes, min_grid_steps,
                   two_cores):
    """Largest sublane-aligned row tile that fits both the per-buffer budget
    and the whole-kernel VMEM limit (incl. f32 intermediates), while keeping
    enough grid steps for TensorCore sharding / pipeline overlap."""
    pack = _sublane_pack(in_itemsize)
    row_in = features * int(in_itemsize)
    row_out = features * int(out_itemsize)
    # VMEM cost of one block row: double-buffered input + output DMA buffers
    # plus ~_F32_INTERMEDIATE_TILES full-tile f32 values live in the body.
    per_row_vmem = 2 * row_in + 2 * row_out + _F32_INTERMEDIATE_TILES * features * 4
    # Headroom: gamma/beta copies + ~1 MiB compiler-internal scratch.
    usable = vmem_limit_bytes - 4 * features * 4 - _MiB
    if usable < pack * per_row_vmem:
        # TODO(synk): add a feature-axis grid dimension (two-level sum /
        # sum-of-squares reduction with pl.when finalize) for very wide hidden
        # sizes instead of refusing.
        raise ValueError(
            f"features={features} is too wide: a minimum {pack}-row block "
            f"needs {pack * per_row_vmem} bytes of VMEM but only {usable} are "
            f"available under vmem_limit_bytes={vmem_limit_bytes}. "
            "Feature-axis tiling is not implemented.")
    t_fit = usable // per_row_vmem
    t_budget = max(tile_budget_bytes // max(row_in, 1), 1)
    tile = min(int(t_fit), int(t_budget))
    tile = max((tile // pack) * pack, pack)
    # Never bigger than the (sublane-rounded) problem itself.
    tile = min(tile, _round_up(rows, pack))
    # Keep >= min_grid_steps grid steps when the problem allows it, so the
    # "parallel" grid axis shards across TensorCores with DMA/compute overlap.
    if rows >= min_grid_steps * pack:
        tile = min(tile, _round_up(_cdiv(rows, min_grid_steps), pack))
    # On dual-core parts, prefer an even number of blocks so both cores get
    # balanced work (avoid one core owning the ragged last block alone).
    if two_cores:
        nblk = _cdiv(rows, tile)
        if nblk > 1 and nblk % 2 == 1:
            tile = max(pack, _round_up(_cdiv(rows, nblk + 1), pack))
    return int(tile)


def layer_norm_pallas(
    x,
    gamma,
    beta,
    eps=1e-6,
    row_tile=None,
    vmem_tile_budget_bytes=None,   # per pipelined buffer; None -> per-generation auto
    vmem_limit_bytes=None,         # None -> per-generation auto
    input_buffer_count=None,       # e.g. 3 to sweep pl.Buffered(3) on v7x; default off
):
    """x: (..., features). gamma/beta: (features,). Normalizes over last axis."""
    orig_shape = x.shape
    features = int(orig_shape[-1])
    rows = 1
    for d in orig_shape[:-1]:
        rows *= int(d)

    x2 = x.reshape(rows, features)
    g2 = gamma.reshape(1, features)
    b2 = beta.reshape(1, features)

    auto_budget, auto_limit, min_grid_steps, two_cores = _tpu_hw_params()
    if vmem_tile_budget_bytes is None:
        vmem_tile_budget_bytes = auto_budget
    if vmem_limit_bytes is None:
        vmem_limit_bytes = auto_limit

    in_itemsize = jnp.dtype(x.dtype).itemsize
    out_itemsize = in_itemsize
    if row_tile is None:
        row_tile = _pick_row_tile(
            rows, features, in_itemsize, out_itemsize,
            vmem_tile_budget_bytes, vmem_limit_bytes, min_grid_steps, two_cores)

    # No host-side padding / slicing: Pallas masks writes of the (possibly
    # partial) last block, and LayerNorm is per-row so padding rows are inert.
    grid = (pl.cdiv(rows, row_tile),)

    kernel = lambda xr, gr, br, orf: _layernorm_kernel(
        xr, gr, br, orf, eps=eps, features=features
    )

    x_spec_kwargs = {}
    if input_buffer_count is not None and int(input_buffer_count) > 2:
        # Deeper input pipelining; only worth sweeping on v7x after the VMEM
        # accounting above leaves headroom.
        x_spec_kwargs["pipeline_mode"] = pl.Buffered(int(input_buffer_count))

    param_bytes = 2 * features * int(jnp.dtype(gamma.dtype).itemsize)
    cost = pl.CostEstimate(
        flops=7 * rows * features,
        transcendentals=2 * rows,                                  # sqrt + recip / row
        bytes_accessed=2 * rows * features * int(in_itemsize) + param_bytes,
    )

    out = pl.pallas_call(
        kernel,
        out_shape=jax.ShapeDtypeStruct((rows, features), x.dtype),
        grid_spec=pltpu.PrefetchScalarGridSpec(
            num_scalar_prefetch=0,
            grid=grid,
            in_specs=[
                pl.BlockSpec((row_tile, features), lambda i: (i, 0), **x_spec_kwargs),
                pl.BlockSpec((1, features), lambda i: (0, 0)),
                pl.BlockSpec((1, features), lambda i: (0, 0)),
            ],
            out_specs=pl.BlockSpec((row_tile, features), lambda i: (i, 0)),
        ),
        compiler_params=pltpu.CompilerParams(
            dimension_semantics=("parallel",),
            vmem_limit_bytes=int(vmem_limit_bytes),
        ),
        cost_estimate=cost,
    )(x2, g2, b2)

    return out.reshape(orig_shape)


if __name__ == "__main__":
    key = jax.random.PRNGKey(0)
    batch, seq, hidden = 2, 8, 32
    # NOTE: hidden=32 (< 128 lanes) is demo-sized; production hidden sizes that
    # are multiples of 128 keep output stores lane-dense (unmasked vst), and
    # bf16 activations halve the HBM traffic of this bandwidth-bound kernel.

    x = jax.random.normal(key, (batch, seq, hidden), dtype=jnp.float32)
    # Deterministic params matching nn.Parameter(torch.ones/zeros(features)).
    gamma = jnp.ones((hidden,), dtype=jnp.float32)
    beta = jnp.zeros((hidden,), dtype=jnp.float32)

    y = layer_norm_pallas(x, gamma, beta, eps=1e-6)
    y = jax.block_until_ready(y)

    # Reference check in plain JAX (unbiased std, eps on std, like the module).
    mean = jnp.mean(x, axis=-1, keepdims=True)
    std = jnp.std(x, axis=-1, keepdims=True, ddof=1)
    ref = gamma * (x - mean) / (std + 1e-6) + beta
    assert jnp.allclose(y, ref, atol=1e-4, rtol=1e-4), "mismatch vs reference"

    print("KERNEL_OK")
</pallas_src>

<mosaic_0001>
module attributes {stable_mosaic.version = 11 : i64} {
  func.func @_lambda_(%arg0: i32, %arg1: memref<8x32xf32, #tpu.memory_space<vmem>>, %arg2: memref<1x32xf32, #tpu.memory_space<vmem>>, %arg3: memref<1x32xf32, #tpu.memory_space<vmem>>, %arg4: memref<8x32xf32, #tpu.memory_space<vmem>>) attributes {dimension_semantics = [#tpu.dimension_semantics<parallel>], iteration_bounds = array<i64: 2>, scalar_prefetch = 0 : i64, scratch_operands = 0 : i64, tpu.core_type = #tpu.core_type<tc>, window_params = [{transform_indices = @transform_0, window_bounds = array<i64: 8, 32>}, {pipeline_mode = #tpu.pipeline_mode<synchronous>, transform_indices = @transform_1, window_bounds = array<i64: 1, 32>}, {pipeline_mode = #tpu.pipeline_mode<synchronous>, transform_indices = @transform_2, window_bounds = array<i64: 1, 32>}, {transform_indices = @transform_3, window_bounds = array<i64: 8, 32>}]} {
    %c0 = arith.constant 0 : index
    %c0_0 = arith.constant 0 : index
    %0 = vector.load %arg1[%c0, %c0_0] : memref<8x32xf32, #tpu.memory_space<vmem>>, vector<8x32xf32>
    %cst = arith.constant dense<0.000000e+00> : vector<8xf32>
    %1 = vector.multi_reduction <add>, %0, %cst [1] : vector<8x32xf32> to vector<8xf32>
    %2 = vector.shape_cast %1 : vector<8xf32> to vector<8x1xf32>
    %3 = arith.mulf %0, %0 : vector<8x32xf32>
    %cst_1 = arith.constant dense<0.000000e+00> : vector<8xf32>
    %4 = vector.multi_reduction <add>, %3, %cst_1 [1] : vector<8x32xf32> to vector<8xf32>
    %5 = vector.shape_cast %4 : vector<8xf32> to vector<8x1xf32>
    %cst_2 = arith.constant 3.125000e-02 : f32
    %6 = vector.broadcast %cst_2 : f32 to vector<8x1xf32>
    %7 = arith.mulf %2, %6 : vector<8x1xf32>
    %8 = arith.mulf %7, %2 : vector<8x1xf32>
    %9 = arith.subf %5, %8 : vector<8x1xf32>
    %cst_3 = arith.constant 3.100000e+01 : f32
    %10 = vector.broadcast %cst_3 : f32 to vector<8x1xf32>
    %11 = arith.divf %9, %10 : vector<8x1xf32>
    %cst_4 = arith.constant 0.000000e+00 : f32
    %12 = vector.broadcast %cst_4 : f32 to vector<8x1xf32>
    %13 = arith.maximumf %11, %12 : vector<8x1xf32>
    %14 = math.sqrt %13 : vector<8x1xf32>
    %cst_5 = arith.constant 9.99999997E-7 : f32
    %15 = vector.broadcast %cst_5 : f32 to vector<8x1xf32>
    %16 = arith.addf %14, %15 : vector<8x1xf32>
    %17 = tpu.reciprocal %16 {approx = true} : vector<8x1xf32> -> vector<8x1xf32>
    %18 = arith.mulf %16, %17 : vector<8x1xf32>
    %cst_6 = arith.constant 2.000000e+00 : f32
    %19 = vector.broadcast %cst_6 : f32 to vector<8x1xf32>
    %20 = arith.subf %19, %18 : vector<8x1xf32>
    %21 = arith.mulf %17, %20 : vector<8x1xf32>
    %c0_7 = arith.constant 0 : index
    %c0_8 = arith.constant 0 : index
    %22 = vector.load %arg2[%c0_7, %c0_8] : memref<1x32xf32, #tpu.memory_space<vmem>>, vector<1x32xf32>
    %c0_9 = arith.constant 0 : index
    %c0_10 = arith.constant 0 : index
    %23 = vector.load %arg3[%c0_9, %c0_10] : memref<1x32xf32, #tpu.memory_space<vmem>>, vector<1x32xf32>
    %24 = vector.broadcast %7 : vector<8x1xf32> to vector<8x32xf32>
    %25 = arith.subf %0, %24 : vector<8x32xf32>
    %26 = vector.broadcast %21 : vector<8x1xf32> to vector<8x32xf32>
    %27 = arith.mulf %25, %26 : vector<8x32xf32>
    %28 = vector.broadcast %22 : vector<1x32xf32> to vector<8x32xf32>
    %29 = arith.mulf %27, %28 : vector<8x32xf32>
    %30 = vector.broadcast %23 : vector<1x32xf32> to vector<8x32xf32>
    %31 = arith.addf %29, %30 : vector<8x32xf32>
    %c0_11 = arith.constant 0 : index
    %c0_12 = arith.constant 0 : index
    %32 = vector.load %arg4[%c0_11, %c0_12] : memref<8x32xf32, #tpu.memory_space<vmem>>, vector<8x32xf32>
    tpu.vector_store %arg4[%c0_11, %c0_12], %31 {strides = array<i32>} : memref<8x32xf32, #tpu.memory_space<vmem>>, vector<8x32xf32>,
    return
  }
  func.func @transform_0(%arg0: i32) -> (i32, i32) {
    %c0_i32 = arith.constant 0 : i32
    %c0_i32_0 = arith.constant 0 : i32
    return %arg0, %c0_i32 : i32, i32
  }
  func.func @transform_1(%arg0: i32) -> (i32, i32) {
    %c0_i32 = arith.constant 0 : i32
    %c0_i32_0 = arith.constant 0 : i32
    %c0_i32_1 = arith.constant 0 : i32
    return %c0_i32, %c0_i32_0 : i32, i32
  }
  func.func @transform_2(%arg0: i32) -> (i32, i32) {
    %c0_i32 = arith.constant 0 : i32
    %c0_i32_0 = arith.constant 0 : i32
    %c0_i32_1 = arith.constant 0 : i32
    return %c0_i32, %c0_i32_0 : i32, i32
  }
  func.func @transform_3(%arg0: i32) -> (i32, i32) {
    %c0_i32 = arith.constant 0 : i32
    %c0_i32_0 = arith.constant 0 : i32
    return %arg0, %c0_i32 : i32, i32
  }
}

</mosaic_0001>

<bundles_post_ra>
// kernel: tpu_custom_call.1
= control target key start
LH: loop header
LB: loop body
LE: loop exit
PB: predicated region body
PF: predicated region fallthrough
CT: control target
= control target key end

     0   :  { %8 = vsyncpa [#allocation3], 0  ;;  %s864_s0 = inlined_call_operand.hbm [shape: f32[16,32], index: 0, kind: input, shape index: {}]   ;;  %s865_s1 = inlined_call_operand.hbm [shape: f32[1,32], index: 1, kind: input, shape index: {}]   ;;  %s866_s2 = inlined_call_operand.hbm [shape: f32[1,32], index: 2, kind: input, shape index: {}]   ;;  %s867_s3 = inlined_call_operand.hbm [shape: f32[16,32], index: 3, kind: output, shape index: {}]  }
   0x1   :  { %10 = vsyncpa [#allocation3 + $0x1], 0 }
   0x2   :  { %11 = vsyncpa [#allocation6], 0 }
   0x3   :  { %12 = vsyncpa [#allocation4], 0 }
   0x4   :  { %14 = vsyncpa [#allocation4 + $0x1], 0  ;;  %s631_s12 = smov 0   ;;  %s633_s13 = smov 0  }
   0x5   :  { %s635_s14 = smov 0   ;;  %s637_s15 = smov 0  }
   0x6 LB: > { %s652_s16 = sadd.s32 4294967295, %s605_s15   ;;  %s360_s17 = sadd.s32 4294967294, %s605_s15   ;;  %s605_s15 = sphi %s637_s15, %s887_s15   ;;  %s601_s14 = sphi %s635_s14, %s886_s14   ;;  %s597_s13 = sphi %s633_s13, %s885_s13   ;;  %s593_s12 = sphi %s631_s12, %s884_s12  }
   0x7   : > { %p40_p0 = scmp.ne.s32.totalorder %s597_s13, %s593_s12  ;;  %p868_p1 = scmp.eq.s32.totalorder %s652_s16, 0 }
   0x8   : > { %p112_p3 = scmp.eq.s32.totalorder %s360_s17, 1  ;;  %p361_p5 = scmp.ge.s32.totalorder %s605_s15, 1 }
   0x9   : > { %p661_p4 = por %p868_p1, %p40_p0  ;;  %p119_p7 = scmp.lt.s32.totalorder %s605_s15, 3 }
   0xa   : > { %p666_p6 = por %p112_p3, %p40_p0  ;;  %s607_s21 = smov [#allocation5]  }
   0xb   : > { %s871_s18 = scalar_select %p661_p4, 1, 0 }
   0xc   : > { %s872_s19 = scalar_select %p666_p6, 1, 0 }
   0xd   : > { %p671_p8 = pnand %p361_p5, %p119_p7  ;;  %s132_s22 = sshll.u32 %s607_s21, 4  ;;  %s133_s22 = int_to_ptr.vmem [resolvable:$true] %s132_s22 }
   0xe   : > { %s608_s23 = smov [#allocation7]   ;;  %s687_s26 = sadd.s32 1, %s605_s15  }
   0xf   : > { %s873_s20 = scalar_select %p671_p8, 1, 0 }
  0x10   : > { %p390_p10 = pneg %p671_p8  ;;  %s143_s24 = sshll.u32 %s608_s23, 4  ;;  %s684_s24 = int_to_ptr.vmem [resolvable:$true] %s143_s24 }
  0x11   : > { %s24_s27 = ssub.s32 %s605_s15, %s687_s26  ;;  %s449_s30 = scalar_lea.hbm %s865_s1, 16 }
  0x12   : > { %p680_p11 = pnand %p390_p10, %p868_p1  ;;  %p450_p12 = scmp.ne.s32.totalorder %s865_s1, %s449_s30 }
  0x13   : > { %p456_p5 = scmp.lt.u32.totalorder %s449_s30, %s865_s1 }
  0x14   : > { %p451_p13 = pneg %p680_p11 }
  0x16   : > { %p452_p0 = pnand %p451_p13, %p450_p12 }
  0x18   : > { %p453_p3 = pneg %p452_p0 }
  0x1a   : > { %p458_p7 = pnand %p456_p5, %p453_p3 }
  0x1c   : > { %461 = shalt.err (!%p458_p7)
}
  0x1d   : > { %s462_s8 = scalar_lea.vmem %s133_s22, 16  ;;  %s469_s9 = scalar_lea.vmem %s133_s22, 32 }
  0x1e   : > { %p463_p10 = scmp.ne.s32.totalorder %s133_s22, %s462_s8  ;;  %p470_p2 = scmp.lt.s32.totalorder %s133_s22, %s133_s22 }
  0x1f   : > { %p471_p6 = scmp.lt.s32.totalorder %s469_s9, %s462_s8 }
  0x20   : > { %p465_p9 = pnand %p463_p10, %p451_p13 }
  0x21   : > { %p472_p4 = por %p471_p6, %p470_p2 }
  0x22   : > { %p466_p1 = pneg %p465_p9 }
  0x24   : > { %p473_p8 = pnand %p472_p4, %p466_p1 }
  0x26   : > { %476 = shalt.err (!%p473_p8)
}
  0x27   : > { %393 = dma.hbm_to_vmem [thread:$0]  (!%p680_p11), %s865_s1, 16, %s133_s22, [#allocation6]  }
  0x28   : > { %s477_s23 = scalar_lea.hbm %s866_s2, 16 }
  0x29   : > { %p478_p9 = scmp.ne.s32.totalorder %s866_s2, %s477_s23  ;;  %p484_p4 = scmp.lt.u32.totalorder %s477_s23, %s866_s2 }
  0x2b   : > { %p480_p2 = pnand %p478_p9, %p451_p13 }
  0x2d   : > { %p481_p1 = pneg %p480_p2 }
  0x2f   : > { %p486_p6 = pnand %p484_p4, %p481_p1 }
  0x31   : > { %489 = shalt.err (!%p486_p6)
}
  0x32   : > { %s490_s22 = scalar_lea.vmem %s684_s24, 16  ;;  %s497_s5 = scalar_lea.vmem %s684_s24, 32 }
  0x33   : > { %p491_p8 = scmp.ne.s32.totalorder %s684_s24, %s490_s22  ;;  %p498_p3 = scmp.lt.s32.totalorder %s684_s24, %s684_s24 }
  0x34   : > { %p499_p5 = scmp.lt.s32.totalorder %s497_s5, %s490_s22 }
  0x35   : > { %p493_p12 = pnand %p491_p8, %p451_p13 }
  0x36   : > { %p500_p7 = por %p499_p5, %p498_p3 }
  0x37   : > { %p494_p0 = pneg %p493_p12 }
  0x39   : > { %p501_p10 = pnand %p500_p7, %p494_p0 }
  0x3b   : > { %504 = shalt.err (!%p501_p10)
}
  0x3c   : > { %396 = dma.hbm_to_vmem [thread:$0]  (!%p680_p11), %s866_s2, 16, %s684_s24, [#allocation6]  }
  0x3d   : > { %p25_p13 = scmp.eq.s32.totalorder %s24_s27, 0  ;;  %s27_s8 = sadd.s32 1, %s601_s14 }
  0x3e   : > { %p34_p9 = scmp.ne.s32.totalorder %s601_s14, %s597_s13  ;;  %p35_p2 = scmp.eq.s32.totalorder %s605_s15, 0 }
  0x3f   : > { %s747_s25 = scalar_select %p25_p13, %s601_s14, %s27_s8  }
  0x40   : > { %p36_p1 = por %p35_p2, %p34_p9  ;;  %p875_p4 = scmp.eq.s32.totalorder %s652_s16, 1 }
  0x41   : > { %p407_p8 = scmp.lt.s32.totalorder %s605_s15, 2  ;;  %s154_s10 = sand.u32 1, %s601_s14  }
  0x42   : > { %p751_p6 = por %p875_p4, %p34_p9  ;;  %s365_s11 = sshll.u32 %s154_s10, 3 }
  0x43   : > { %s366_s17 = sshll.u32 %s605_s15, 7  ;;  %s158_s27 = scalar_lea.vmem [#allocation2], %s365_s11 }
  0x44   : > { %s761_s24 = scalar_lea.hbm %s864_s0, %s366_s17  ;;  %s165_s28 = sshll.u32 %s158_s27, 4  ;;  %s763_s28 = int_to_ptr.vmem [resolvable:$true] %s165_s28 }
  0x45   : > { %p765_p11 = pnand %p407_p8, %p36_p1  ;;  %s155_s30 = scalar_lea.sflag [#allocation3], %s154_s10 }
  0x46   : > { %s505_s4 = scalar_lea.hbm %s761_s24, 128  ;;  %s510_s6 = scalar_lea.hbm %s864_s0, 256 }
  0x47   : > { %p506_p12 = scmp.ne.s32.totalorder %s761_s24, %s505_s4  ;;  %p507_p0 = pneg %p765_p11 }
  0x48   : > { %p511_p7 = scmp.lt.u32.totalorder %s761_s24, %s864_s0  ;;  %p512_p10 = scmp.lt.u32.totalorder %s510_s6, %s505_s4 }
  0x49   : > { %p508_p3 = pnand %p507_p0, %p506_p12  ;;  %p514_p9 = scmp.lt.u32.totalorder %s505_s4, %s761_s24 }
  0x4a   : > { %p513_p13 = por %p512_p10, %p511_p7 }
  0x4b   : > { %p509_p5 = pneg %p508_p3 }
  0x4c   : > { %p515_p2 = por %p514_p9, %p513_p13 }
  0x4e   : > { %p516_p1 = pnand %p515_p2, %p509_p5 }
  0x50   : > { %519 = shalt.err (!%p516_p1)
}
  0x51   : > { %s520_s10 = scalar_lea.vmem %s763_s28, 128  ;;  %s609_s11 = smov [#allocation2]  }
  0x52   : > { %p521_p4 = scmp.ne.s32.totalorder %s763_s28, %s520_s10  ;;  %s525_s17 = sshll.u32 %s609_s11, 4  ;;  %s526_s17 = int_to_ptr.vmem [resolvable:$false] %s525_s17 }
  0x53   : > { %s527_s21 = scalar_lea.vmem %s526_s17, 256  ;;  %p528_p3 = scmp.lt.s32.totalorder %s763_s28, %s526_s17 }
  0x54   : > { %p523_p8 = pnand %p521_p4, %p507_p0  ;;  %p529_p7 = scmp.lt.s32.totalorder %s527_s21, %s520_s10 }
  0x56   : > { %p524_p12 = pneg %p523_p8  ;;  %p530_p10 = por %p529_p7, %p528_p3 }
  0x58   : > { %p531_p13 = pnand %p530_p10, %p524_p12 }
  0x5a   : > { %534 = shalt.err (!%p531_p13)
}
  0x5b   : > { %400 = dma.hbm_to_vmem [thread:$0]  (!%p765_p11), %s761_s24, 128, %s763_s28, %s155_s30  }
  0x5c   : > { %p878_p5 = scmp.ne.s32.totalorder %s873_s20, 0 }
  0x5d   : > { %s797_s23 = sand.u32 (!%p878_p5), 1, %s597_s13   ;;  %p879_p0 = scmp.ne.s32.totalorder (!%p878_p5), %s871_s18, 0 }
  0x5e   : > { %174 = sbr.rel (%p878_p5) target bundleno = 313 (0x139), region = 32  ;;  %s368_s27 = sshll.u32 (!%p878_p5), %s797_s23, 3 }
  0x5f   : > { %s177_s4 = scalar_lea.sflag (!%p878_p5), [#allocation3], %s797_s23  ;;  %s180_s22 = scalar_lea.vmem (!%p878_p5), [#allocation2], %s368_s27 }
  0x65   : > { %580 = dma.done.wait (%p879_p0), %s177_s4, 128  }
  0x66   : > { %582 = vsyncadd (%p879_p0), %s177_s4, 4294967168  ;;  %p880_p11 = scmp.eq.s32.totalorder %s652_s16, 0 }
  0x68   : > { %584 = dma.done.wait (%p880_p11), [#allocation6], 32   ;;  %p881_p9 = pmov %p880_p11 }
  0x69   : > { %vm212_vm0 = vcmask 261120   ;;  %v211_v0 = vld [vmem:[%s180_s22] sm:$0xff]  ;;  %v372_v22 = vld [vmem:[#allocation5] ss:$0 sm:$0xff]  ;;  %v373_v24 = vld [vmem:[#allocation7] ss:$0 sm:$0xff] }
  0x6a   : > { %586 = vsyncadd (%p881_p9), [#allocation6], 4294967264  ;;  %v213_v1 = vsel %vm212_vm0, %v211_v0, 0.0  ;;  %v216_v2 = vmul.f32 %v211_v0, %v211_v0  ;;  %s375_s18 = sshll.u32 %s652_s16, 7  ;;  %s210_s20 = scalar_lea.vmem [#allocation8], %s368_s27 }
  0x6b   : > { %214 = vadd.xlane.f32.xlu0 %v213_v1  ;;  %s271_s24 = sshll.u32 %s210_s20, 4  ;;  %s819_s30 = scalar_lea.hbm %s867_s3, %s375_s18  ;;  %s821_s24 = int_to_ptr.vmem [resolvable:$true] %s271_s24 }
  0x6c   : > { %v217_v3 = vsel %vm212_vm0, %v216_v2, 0.0  ;;  %s258_s5 = scalar_lea.sflag [#allocation4], %s797_s23  ;;  %s535_s6 = scalar_lea.vmem %s821_s24, 128 }
  0x6d   : > { %p536_p2 = scmp.ne.s32.totalorder %s821_s24, %s535_s6  ;;  %s610_s16 = smov [#allocation8]  }
  0x6e   : > { %s539_s7 = sshll.u32 %s610_s16, 4  ;;  %s540_s7 = int_to_ptr.vmem [resolvable:$false] %s539_s7 }
  0x6f   : > { %218 = vadd.xlane.f32.xlu0 %v217_v3  ;;  %p537_p1 = pnand %p536_p2, %p751_p6  ;;  %s541_s8 = scalar_lea.vmem %s540_s7, 256 }
  0x70   : > { %p542_p8 = scmp.lt.s32.totalorder %s821_s24, %s540_s7  ;;  %p543_p12 = scmp.lt.s32.totalorder %s541_s8, %s535_s6 }
  0x71   : > { %p538_p4 = pneg %p537_p1 }
  0x72   : > { %p544_p3 = por %p543_p12, %p542_p8 }
  0x74   : > { %p545_p7 = pnand %p544_p3, %p538_p4 }
  0xf8   : > { %v215_v4 = vpop.xlane.xlu0 %214 }
  0xf9   : > { %v220_v5 = vmul.f32 0.03125, %v215_v4 }
  0xfb   : > { %v221_v6 = vmul.f32 %v220_v5, %v215_v4  ;;  %v240_v20 = vsub.f32 %v211_v0, %v220_v5 }
  0xfc   : > { %v219_v7 = vpop.xlane.xlu0 %218 }
  0xfd   : > { %v222_v8 = vsub.f32 %v219_v7, %v221_v6 }
  0xff   : > { %v224_v9 = vmul.f32 0.032258064, %v222_v8 }
 0x101   : > { %v225_v10 = vmax.f32 %v224_v9, 0.0 }
 0x103   : > { %445 = vrsqrt.f32 %v225_v10  ;;  %vm228_vm1 = vcmp.eq.f32.partialorder %v225_v10, inf  ;;  %v231_v13 = vand.u32 2147483648, %v225_v10  ;;  %vm230_vm2 = vcmp.eq.f32.partialorder %v225_v10, 0.0 }
 0x10d   : > { %v446_v11 = vpop.eup %445 }
 0x10e   : > { %v227_v12 = vmul.f32 %v446_v11, %v225_v10 }
 0x110   : > { %v229_v14 = vsel %vm228_vm1, %v225_v10, %v227_v12 }
 0x111   : > { %v232_v15 = vsel %vm230_vm2, %v231_v13, %v229_v14 }
 0x112   : > { %v233_v16 = vadd.f32 1e-06, %v232_v15 }
 0x114   : > { %447 = vrcp.f32 %v233_v16 }
 0x11e   : > { %v448_v17 = vpop.eup %447 }
 0x11f   : > { %v235_v18 = vmul.f32 %v448_v17, %v233_v16 }
 0x121   : > { %v236_v19 = vsub.f32 2.0, %v235_v18 }
 0x123   : > { %v237_v21 = vmul.f32 %v448_v17, %v236_v19 }
 0x125   : > { %v241_v23 = vmul.f32 %v240_v20, %v237_v21 }
 0x127   : > { %v248_v25 = vmul.f32 %v372_v22, %v241_v23 }
 0x129   : > { %v255_v26 = vadd.f32 %v373_v24, %v248_v25 }
 0x12b   : > { %256 = vst.msk [vmem:[%s210_s20] sm:$0xff] %vm212_vm0, %v255_v26 }
 0x12c   : > { %548 = shalt.err (!%p545_p7)
}
 0x12d   : > { %s549_s10 = scalar_lea.hbm %s819_s30, 128  ;;  %s553_s21 = scalar_lea.hbm %s867_s3, 256 }
 0x12e   : > { %p550_p10 = scmp.ne.s32.totalorder %s819_s30, %s549_s10  ;;  %p554_p0 = scmp.lt.u32.totalorder %s819_s30, %s867_s3 }
 0x12f   : > { %p555_p11 = scmp.lt.u32.totalorder %s553_s21, %s549_s10  ;;  %p557_p2 = scmp.lt.u32.totalorder %s549_s10, %s819_s30 }
 0x130   : > { %p551_p13 = pnand %p550_p10, %p751_p6 }
 0x131   : > { %p556_p9 = por %p555_p11, %p554_p0 }
 0x132   : > { %p552_p5 = pneg %p551_p13 }
 0x133   : > { %p558_p1 = por %p557_p2, %p556_p9 }
 0x135   : > { %p559_p4 = pnand %p558_p1, %p552_p5 }
 0x137   : > { %562 = shalt.err (!%p559_p4)
}
 0x138   : > { %388 = dma.vmem_to_hbm [thread:$0]  (%p751_p6), %s821_s24, 128, %s819_s30, %s258_s5  }
 0x139 PF: > { %s283_s4 = sand.u32 1, %s593_s12   ;;  %p882_p8 = scmp.ne.s32.totalorder %s872_s19, 0 }
 0x13a   : > { %p883_p12 = scmp.ge.s32.totalorder %s605_s15, 2  ;;  %s284_s22 = scalar_lea.sflag [#allocation4], %s283_s4 }
 0x13c   : > { %p402_p3 = pnand %p883_p12, %p882_p8 }
 0x13e   : > { %588 = dma.done.wait (!%p402_p3), %s284_s22, 128  }
 0x13f   : > { %590 = vsyncadd (!%p402_p3), %s284_s22, 4294967168  ;;  %p17_p7 = scmp.ge.s32.totalorder %s687_s26, 4   ;;  %s884_s12 = smov %s597_s13 }
 0x140   : > { %s885_s13 = smov %s601_s14  ;;  %s886_s14 = smov %s747_s25 }
 0x141   : > { %s887_s15 = smov %s687_s26  ;;  %19 = sbr.rel (!%p17_p7) target bundleno = 6 (0x6), region = 85 }
 0x148   :  { %289 = vsyncpa [#allocation3], 1 }
 0x149   :  { %291 = vsyncpa [#allocation3 + $0x1], 1 }
 0x14a   :  { %292 = vsyncpa [#allocation6], 1 }
 0x14b   :  { %293 = vsyncpa [#allocation4], 1 }
 0x14c   :  { %295 = vsyncpa [#allocation4 + $0x1], 1 }

</bundles_post_ra>
